<compile_context>
chip_gen: v7x
topology: tpu7x:2x2x1
jax: 0.10.0
libtpu: 0.0.40
codegen_flags: <defaults>
</compile_context>

<pallas_src>
import jax
import jax.numpy as jnp
from jax.experimental import pallas as pl
from jax.experimental.pallas import tpu as pltpu


def _round_up(x, m):
    return ((x + m - 1) // m) * m


# ----------------------------- encoder kernel -------------------------------
def _encoder_kernel(x_ref, w_ref, b_ref, o_ref):
    y = jnp.dot(x_ref[...], w_ref[...], preferred_element_type=jnp.float32) + b_ref[...]
    o_ref[...] = jnp.maximum(y, 0.0)


def encode(x_nchw, w_enc, b_enc, *, tile_m=256):
    """1x1-conv stand-in for the backbone: NCHW -> (B, H*W, F), pointwise + ReLU."""
    B, Cin, Hs, Ws = x_nchw.shape
    F = w_enc.shape[1]
    M = B * Hs * Ws
    # NCHW -> NHWC -> (B*H*W, Cin)  (matches Encoder's permute(0,2,3,1).view(B, H*W, C))
    x2d = jnp.transpose(x_nchw, (0, 2, 3, 1)).reshape(M, Cin)

    # Row-tile sized conservatively for v7x's smaller VMEM; toy sizes collapse to one tile.
    tm = min(tile_m, _round_up(M, 8))
    Mp = _round_up(M, tm)
    if Mp != M:
        x2d = jnp.pad(x2d, ((0, Mp - M), (0, 0)))

    out = pl.pallas_call(
        _encoder_kernel,
        out_shape=jax.ShapeDtypeStruct((Mp, F), jnp.float32),
        grid=(Mp // tm,),
        in_specs=[
            pl.BlockSpec((tm, Cin), lambda i: (i, 0)),
            pl.BlockSpec((Cin, F), lambda i: (0, 0)),
            pl.BlockSpec((1, F), lambda i: (0, 0)),
        ],
        out_specs=pl.BlockSpec((tm, F), lambda i: (i, 0)),
        compiler_params=pltpu.CompilerParams(dimension_semantics=("parallel",)),
    )(x2d, w_enc, b_enc)
    return out[:M].reshape(B, Hs * Ws, F)


# ----------------------------- decoder kernel -------------------------------
def _decoder_kernel(bs_ref, feat_ref, emb_ref,
                    w2_ref, b2_ref, ws_col_ref,
                    w_init_ref, b_init_ref,
                    w_h_ref, b_h_ref,
                    w_ihe_ref, b_ih_ref, w_ihc_ref,
                    w_out_ref, b_out_ref,
                    out_ref):
    feat = feat_ref[...]                                   # (Bb, L, F)
    emb = emb_ref[...]                                     # (Bb, S, E)
    Bb, L, F = feat.shape
    S = out_ref.shape[1]
    E = emb.shape[2]
    A = w2_ref.shape[1]
    H = w_init_ref.shape[1] // 2
    H4 = 4 * H

    # Decoder.init_hidden: mean over annotations, then two linears fused into one dot.
    mean_feat = jnp.mean(feat, axis=1)                     # (Bb, F)
    hc0 = (jnp.dot(mean_feat, w_init_ref[...], preferred_element_type=jnp.float32)
           + b_init_ref[...])                              # (Bb, 2H) = [short_m | long_m]
    h = hc0[:, :H]
    c = hc0[:, H:]

    # Loop-invariant matmuls (hoisted out of the time loop).
    #   BahdanauAttention.fc2(encoder_output): one (Bb*L, F) @ (F, A) dot.
    x_enc = (jnp.dot(feat.reshape(Bb * L, F), w2_ref[...],
                     preferred_element_type=jnp.float32)
             + b2_ref[...]).reshape(Bb, L, A)
    #   Embedding part of the LSTM input projection (+ b_ih folded in): one dot.
    emb_gates = (jnp.dot(emb.reshape(Bb * S, E), w_ihe_ref[...],
                         preferred_element_type=jnp.float32)
                 + b_ih_ref[...]).reshape(Bb, S, H4)

    ws_col = ws_col_ref[...]                               # (A, 1)
    bs = bs_ref[0, 0]                                      # scalar from SMEM

    logits_list = []
    # Statically unrolled time loop (S is small & fixed) so the LLO scheduler can
    # overlap MXU / VPU / EUP work across steps.
    for s in range(S):
        # One fused h-matmul: [W_hh | W_fc1] -> first 4H lanes are the recurrent gate
        # pre-activation, trailing A lanes are the attention query fc1(h)+b1.
        hw = (jnp.dot(h, w_h_ref[...], preferred_element_type=jnp.float32)
              + b_h_ref[...])                              # (Bb, 4H + A)
        gates_h = hw[:, :H4]                               # h @ W_hh + b_hh
        x_dec = hw[:, H4:]                                 # fc1(h)

        # --- BahdanauAttention ---
        comb = jnp.tanh(x_enc + x_dec[:, None, :])         # (Bb, L, A)
        # attention scores on the MXU: (Bb*L, A) @ (A, 1)
        scores = (jnp.dot(comb.reshape(Bb * L, A), ws_col,
                          preferred_element_type=jnp.float32).reshape(Bb, L) + bs)
        scores = scores - jnp.max(scores, axis=1, keepdims=True)
        e = jnp.exp(scores)
        inv = pl.reciprocal(jnp.sum(e, axis=1, keepdims=True), approx=True)
        alpha = e * inv                                     # softmax over L
        context = jnp.einsum("bl,blf->bf", alpha, feat,
                             preferred_element_type=jnp.float32)   # (Bb, F)

        # --- LSTMCell (PyTorch gate order i, f, g, o) ---
        gates = (emb_gates[:, s, :] + gates_h
                 + jnp.dot(context, w_ihc_ref[...],
                           preferred_element_type=jnp.float32))    # (Bb, 4H)
        i_g = jax.nn.sigmoid(gates[:, 0:H])
        f_g = jax.nn.sigmoid(gates[:, H:2 * H])
        g_g = jnp.tanh(gates[:, 2 * H:3 * H])
        o_g = jax.nn.sigmoid(gates[:, 3 * H:4 * H])
        c = f_g * c + i_g * g_g
        h = o_g * jnp.tanh(c)

        # --- output linear (dropout = identity in eval semantics) ---
        logits_list.append(
            jnp.dot(h, w_out_ref[...], preferred_element_type=jnp.float32) + b_out_ref[...])

    # Single lane-dense slab store of all steps (no per-step masked row stores).
    out_ref[...] = jnp.stack(logits_list, axis=1)          # (Bb, S, V)


def _rep(shape):
    nd = len(shape)
    return pl.BlockSpec(shape, lambda b, _nd=nd: (0,) * _nd)


def decode(features, emb, p, *, batch_block=None):
    B, L, F = features.shape
    S, E = emb.shape[1], emb.shape[2]
    V = p["w_out"].shape[1]

    # Wrapper-side weight fusions (pure layout plumbing, done once).
    w_init = jnp.concatenate([p["w_sh"], p["w_lg"]], axis=1)    # (F, 2H)
    b_init = jnp.concatenate([p["b_sh"], p["b_lg"]], axis=1)    # (1, 2H)
    w_h = jnp.concatenate([p["w_hh"], p["w1"]], axis=1)         # (H, 4H + A), lane-aligned split
    b_h = jnp.concatenate([p["b_hh"], p["b1"]], axis=1)         # (1, 4H + A)
    w_s_col = p["w_s"].T                                        # (A, 1) for the MXU score matmul

    bb = B if batch_block is None else min(batch_block, B)
    Bp = _round_up(B, bb)
    if Bp != B:
        features = jnp.pad(features, ((0, Bp - B), (0, 0), (0, 0)))
        emb = jnp.pad(emb, ((0, Bp - B), (0, 0), (0, 0)))

    weights = [p["w2"], p["b2"], w_s_col,
               w_init, b_init, w_h, b_h,
               p["w_ih_e"], p["b_ih"], p["w_ih_c"],
               p["w_out"], p["b_out"]]

    in_specs = ([pl.BlockSpec(memory_space=pltpu.MemorySpace.SMEM),   # scalar score bias
                 pl.BlockSpec((bb, L, F), lambda b: (b, 0, 0)),
                 pl.BlockSpec((bb, S, E), lambda b: (b, 0, 0))]
                + [_rep(w.shape) for w in weights])
    out_specs = pl.BlockSpec((bb, S, V), lambda b: (b, 0, 0))

    out = pl.pallas_call(
        _decoder_kernel,
        out_shape=jax.ShapeDtypeStruct((Bp, S, V), jnp.float32),
        grid=(Bp // bb,),
        in_specs=in_specs,
        out_specs=out_specs,
        compiler_params=pltpu.CompilerParams(dimension_semantics=("parallel",)),
    )(p["b_s"], features, emb, *weights)
    return out[:B]


# ----------------------------- full forward ---------------------------------
def encoder_to_decoder_forward(X, y, p):
    features = encode(X, p["w_enc"], p["b_enc"])           # (B, L, F)
    emb = p["emb_table"][y][:, :y.shape[1] - 1]            # (B, S, E), S = T_y - 1
    return decode(features, emb, p)                        # (B, S, V)


# --------------------------- pure-JAX reference ------------------------------
def reference_forward(X, y, p):
    B, Cin, Hs, Ws = X.shape
    x2d = jnp.transpose(X, (0, 2, 3, 1)).reshape(B * Hs * Ws, Cin)
    feat = jnp.maximum(x2d @ p["w_enc"] + p["b_enc"], 0.0).reshape(B, Hs * Ws, -1)
    emb = p["emb_table"][y]
    S = y.shape[1] - 1
    H = p["w_hh"].shape[0]
    mean_feat = jnp.mean(feat, axis=1)
    h = mean_feat @ p["w_sh"] + p["b_sh"]
    c = mean_feat @ p["w_lg"] + p["b_lg"]
    outs = []
    for s in range(S):
        x_dec = h @ p["w1"] + p["b1"]
        x_enc = jnp.einsum("blf,fa->bla", feat, p["w2"]) + p["b2"]
        comb = jnp.tanh(x_enc + x_dec[:, None, :])
        scores = jnp.sum(comb * p["w_s"][None, :, :], axis=-1) + p["b_s"][0, 0]
        alpha = jax.nn.softmax(scores, axis=1)
        context = jnp.sum(feat * alpha[:, :, None], axis=1)
        gates = (emb[:, s] @ p["w_ih_e"] + context @ p["w_ih_c"] + p["b_ih"]
                 + h @ p["w_hh"] + p["b_hh"])
        i = jax.nn.sigmoid(gates[:, :H])
        f = jax.nn.sigmoid(gates[:, H:2 * H])
        g = jnp.tanh(gates[:, 2 * H:3 * H])
        o = jax.nn.sigmoid(gates[:, 3 * H:])
        c = f * c + i * g
        h = o * jnp.tanh(c)
        outs.append(h @ p["w_out"] + p["b_out"])
    return jnp.stack(outs, axis=1)


# --------------------------------- main --------------------------------------
if __name__ == "__main__":
    # small, forward-consistent shapes
    B, Cin, Hs, Ws = 2, 4, 4, 4      # images (NCHW)
    F = 32                           # num_features (stand-in for 2048)
    E, H, A, V = 16, 32, 16, 64      # embed, hidden, attn_dim, vocab
    Ty = 9                           # caption length -> seq_len = 8

    kx, ky = jax.random.split(jax.random.PRNGKey(0))
    X = jax.random.normal(kx, (B, Cin, Hs, Ws), dtype=jnp.float32)
    y = jax.random.randint(ky, (B, Ty), 0, V, dtype=jnp.int32)

    keys = jax.random.split(jax.random.PRNGKey(42), 24)
    rnd = lambda k, s, sc=0.1: (sc * jax.random.normal(k, s)).astype(jnp.float32)

    params = {
        # encoder stand-in (1x1 conv Cin->F)
        "w_enc": rnd(keys[0], (Cin, F)), "b_enc": rnd(keys[1], (1, F)),
        # embedding
        "emb_table": rnd(keys[2], (V, E)),
        # BahdanauAttention
        "w1": rnd(keys[3], (H, A)), "b1": rnd(keys[4], (1, A)),
        "w2": rnd(keys[5], (F, A)), "b2": rnd(keys[6], (1, A)),
        "w_s": rnd(keys[7], (1, A)), "b_s": rnd(keys[8], (1, 1)),
        # init_hidden linears
        "w_sh": rnd(keys[9], (F, H)), "b_sh": rnd(keys[10], (1, H)),
        "w_lg": rnd(keys[11], (F, H)), "b_lg": rnd(keys[12], (1, H)),
        # LSTMCell (input split into embedding part and context part)
        "w_ih_e": rnd(keys[13], (E, 4 * H)), "w_ih_c": rnd(keys[14], (F, 4 * H)),
        "w_hh": rnd(keys[15], (H, 4 * H)),
        "b_ih": rnd(keys[16], (1, 4 * H)), "b_hh": rnd(keys[17], (1, 4 * H)),
        # output linear
        "w_out": rnd(keys[18], (H, V)), "b_out": rnd(keys[19], (1, V)),
    }

    out = jax.block_until_ready(encoder_to_decoder_forward(X, y, params))
    ref = jax.block_until_ready(reference_forward(X, y, params))

    assert out.shape == (B, Ty - 1, V), out.shape
    # tolerance allows for the approximate (EUP) reciprocal in the softmax
    assert jnp.allclose(out, ref, atol=5e-3, rtol=5e-3), float(jnp.max(jnp.abs(out - ref)))
    print("KERNEL_OK")
</pallas_src>

<mosaic_0001>
module attributes {stable_mosaic.version = 11 : i64} {
  func.func @_encoder_kernel(%arg0: i32, %arg1: memref<32x4xf32, #tpu.memory_space<vmem>>, %arg2: memref<4x32xf32, #tpu.memory_space<vmem>>, %arg3: memref<1x32xf32, #tpu.memory_space<vmem>>, %arg4: memref<32x32xf32, #tpu.memory_space<vmem>>) attributes {dimension_semantics = [#tpu.dimension_semantics<parallel>], iteration_bounds = array<i64: 1>, scalar_prefetch = 0 : i64, scratch_operands = 0 : i64, tpu.core_type = #tpu.core_type<tc>, window_params = [{transform_indices = @transform_0, window_bounds = array<i64: 32, 4>}, {pipeline_mode = #tpu.pipeline_mode<synchronous>, transform_indices = @transform_1, window_bounds = array<i64: 4, 32>}, {pipeline_mode = #tpu.pipeline_mode<synchronous>, transform_indices = @transform_2, window_bounds = array<i64: 1, 32>}, {transform_indices = @transform_3, window_bounds = array<i64: 32, 32>}]} {
    %c0 = arith.constant 0 : index
    %c0_0 = arith.constant 0 : index
    %0 = vector.load %arg1[%c0, %c0_0] : memref<32x4xf32, #tpu.memory_space<vmem>>, vector<32x4xf32>
    %c0_1 = arith.constant 0 : index
    %c0_2 = arith.constant 0 : index
    %1 = vector.load %arg2[%c0_1, %c0_2] : memref<4x32xf32, #tpu.memory_space<vmem>>, vector<4x32xf32>
    %cst = arith.constant dense<0.000000e+00> : vector<32x32xf32>
    %2 = tpu.matmul %0, %1, %cst {dimension_numbers = #tpu.dot_dimension_numbers<[1], [0], [0], [1], [0, 0, 1, 1], [], []>} : vector<32x4xf32>, vector<4x32xf32>, vector<32x32xf32> -> vector<32x32xf32>
    %c0_3 = arith.constant 0 : index
    %c0_4 = arith.constant 0 : index
    %3 = vector.load %arg3[%c0_3, %c0_4] : memref<1x32xf32, #tpu.memory_space<vmem>>, vector<1x32xf32>
    %4 = vector.broadcast %3 : vector<1x32xf32> to vector<32x32xf32>
    %5 = arith.addf %2, %4 : vector<32x32xf32>
    %cst_5 = arith.constant 0.000000e+00 : f32
    %6 = vector.broadcast %cst_5 : f32 to vector<32x32xf32>
    %7 = arith.maximumf %5, %6 : vector<32x32xf32>
    %c0_6 = arith.constant 0 : index
    %c0_7 = arith.constant 0 : index
    %8 = vector.load %arg4[%c0_6, %c0_7] : memref<32x32xf32, #tpu.memory_space<vmem>>, vector<32x32xf32>
    tpu.vector_store %arg4[%c0_6, %c0_7], %7 {strides = array<i32>} : memref<32x32xf32, #tpu.memory_space<vmem>>, vector<32x32xf32>,
    return
  }
  func.func @transform_0(%arg0: i32) -> (i32, i32) {
    %c0_i32 = arith.constant 0 : i32
    %c0_i32_0 = arith.constant 0 : i32
    return %arg0, %c0_i32 : i32, i32
  }
  func.func @transform_1(%arg0: i32) -> (i32, i32) {
    %c0_i32 = arith.constant 0 : i32
    %c0_i32_0 = arith.constant 0 : i32
    %c0_i32_1 = arith.constant 0 : i32
    return %c0_i32, %c0_i32_0 : i32, i32
  }
  func.func @transform_2(%arg0: i32) -> (i32, i32) {
    %c0_i32 = arith.constant 0 : i32
    %c0_i32_0 = arith.constant 0 : i32
    %c0_i32_1 = arith.constant 0 : i32
    return %c0_i32, %c0_i32_0 : i32, i32
  }
  func.func @transform_3(%arg0: i32) -> (i32, i32) {
    %c0_i32 = arith.constant 0 : i32
    %c0_i32_0 = arith.constant 0 : i32
    return %arg0, %c0_i32 : i32, i32
  }
}

</mosaic_0001>

<bundles_post_ra>
// kernel: tpu_custom_call.1
= control target key start
LH: loop header
LB: loop body
LE: loop exit
PB: predicated region body
PF: predicated region fallthrough
CT: control target
= control target key end

     0   :  { %vm40_vm0 = vcmask 1043456   ;;  %vm27_vm1 = vcmask 31744   ;;  %s255_s0 = inlined_call_operand.vmem [shape: f32[32,4], index: 0, kind: input, shape index: {}]   ;;  %s256_s1 = inlined_call_operand.vmem [shape: f32[4,32], index: 1, kind: input, shape index: {}]   ;;  %s257_s2 = inlined_call_operand.vmem [shape: f32[1,32], index: 2, kind: input, shape index: {}]   ;;  %s258_s3 = inlined_call_operand.hbm [shape: f32[32,32], index: 3, kind: output, shape index: {}]  }
   0x1   :  { %v19_v0 = vld [vmem:[%s256_s1] sm:$0xf]  ;;  %v17_v2 = vld [vmem:[%s255_s0 + $0x10] sm:$0xff]  ;;  %v16_v3 = vld [vmem:[%s255_s0 + $0x8] sm:$0xff] }
   0x2   :  { %v15_v1 = vld [vmem:[%s255_s0] sm:$0xff]  ;;  %165 = vmatprep.subr.msk.mxu0 %vm40_vm0, %v19_v0  ;;  %173 = vmatprep.subr.msk.mxu1 %vm40_vm0, %v19_v0  ;;  %v18_v4 = vld [vmem:[%s255_s0 + $0x18] sm:$0xff] }
   0x3   :  { %8 = vsyncpa [#allocation3], 0  ;;  %166 = vmatpush3.msk.msra.mxu0 %vm40_vm0, %v19_v0  ;;  %174 = vmatpush3.msk.msra.mxu1 %vm40_vm0, %v19_v0  ;;  %v154_v5 = vld [vmem:[%s257_s2] ss:$0 sm:$0xff]  ;;  %s202_s23 = smov [#allocation2]   ;;  %vm133_vm2 = vcmask 261120  }
   0x4   :  { %167 = vmatprep.mubr.msk.f32.mxu0 %vm27_vm1, %v15_v1  ;;  %170 = vmatprep.mubr.msk.f32.mxu1 %vm27_vm1, %v17_v2  ;;  %s143_s24 = sshll.u32 %s202_s23, 4  ;;  %s144_s24 = int_to_ptr.vmem [resolvable:$true] %s143_s24 }
   0x5   :  { %168 = vmatmul.mubr.msk.f32.vlgmr.msra.gmra.mrb[0].mxu0 %vm27_vm1, %v16_v3  ;;  %171 = vmatmul.mubr.msk.f32.vlgmr.msra.gmra.mrb[0].mxu1 %vm27_vm1, %v18_v4  ;;  %s178_s0 = scalar_lea.vmem %s144_s24, 512  ;;  %p183_p1 = scmp.lt.s32.totalorder %s144_s24, %s144_s24 }
   0x6   :  { %p179_p0 = scmp.ne.s32.totalorder %s144_s24, %s178_s0  ;;  %p184_p2 = scmp.lt.s32.totalorder %s178_s0, %s178_s0 }
   0x8   :  { %p185_p3 = por %p184_p2, %p183_p1 }
   0xa   :  { %p186_p4 = pnand %p185_p3, %p179_p0 }
  0xd8   :  { %v169_v6 = vpop.f32.mrb[0].mxu0  ;;  %v172_v7 = vpop.f32.mrb[0].mxu1 }
  0xd9   :  { %v116_v8 = vadd.f32 %v169_v6, %v154_v5  ;;  %v126_v9 = vadd.f32 %v172_v7, %v154_v5  ;;  %v110_v10 = vpop.f32.mrb[1].mxu0  ;;  %v120_v11 = vpop.f32.mrb[1].mxu1 }
  0xda   :  { %v111_v12 = vadd.f32 %v154_v5, %v110_v10  ;;  %v121_v13 = vadd.f32 %v154_v5, %v120_v11 }
  0xdb   :  { %v130_v14 = vmax.f32 %v116_v8, 0.0  ;;  %v132_v15 = vmax.f32 %v126_v9, 0.0 }
  0xdc   :  { %v129_v16 = vmax.f32 %v111_v12, 0.0  ;;  %v131_v17 = vmax.f32 %v121_v13, 0.0 }
  0xdd   :  { %135 = vst.msk [vmem:[#allocation2 + $0x8] sm:$0xff] %vm133_vm2, %v130_v14  ;;  %137 = vst.msk [vmem:[#allocation2 + $0x18] sm:$0xff] %vm133_vm2, %v132_v15 }
  0xde   :  { %134 = vst.msk [vmem:[#allocation2] sm:$0xff] %vm133_vm2, %v129_v16  ;;  %136 = vst.msk [vmem:[#allocation2 + $0x10] sm:$0xff] %vm133_vm2, %v131_v17 }
  0xdf   :  { %189 = shalt.err (!%p186_p4)
}
  0xe0   :  { %s190_s26 = scalar_lea.hbm %s258_s3, 512 }
  0xe1   :  { %p191_p5 = scmp.ne.s32.totalorder %s258_s3, %s190_s26  ;;  %p194_p6 = scmp.lt.u32.totalorder %s190_s26, %s258_s3 }
  0xe3   :  { %p196_p7 = pnand %p194_p6, %p191_p5 }
  0xe5   :  { %199 = shalt.err (!%p196_p7)
}
  0xe6   :  { %s203_s4 = smov 128   ;;  %s204_s5 = smov 8  }
  0xe7   :  { %149 = dma.vmem_to_hbm [thread:$0]  %s144_s24, 512, %s258_s3, [#allocation3], %s203_s4, %s203_s4, %s204_s5  }
  0xe8   :  { %200 = dma.done.wait [#allocation3], 512  }
  0xe9   :  { %201 = vsyncadd [#allocation3], 4294966784 }
  0xea   :  { %153 = vsyncpa [#allocation3], 1 }

</bundles_post_ra>
